<compile_context>
chip_gen: v7x
topology: tpu7x:2x2x1
jax: 0.10.0
libtpu: 0.0.40
codegen_flags: <defaults>
</compile_context>

<pallas_src>
import jax
import jax.numpy as jnp
from jax import lax
from jax.experimental import pallas as pl
from jax.experimental.pallas import tpu as pltpu

IN_DIM = 98
HID = 300
OUT_DIM = 1
BN_EPS = 1e-5

HID_PAD = 384            # 300 -> 384 (lane multiple)
ONE_LANE = HID_PAD - 1   # padded lane forced to 1.0 after ReLU; carries fc3 bias


def _round_up(a, b):
    return ((a + b - 1) // b) * b


def _cdiv(a, b):
    return (a + b - 1) // b


def mlp_kernel(x_ref, w1_ref, b1_ref, w2_ref, b2_ref, w3_ref, o_ref):
    # fc1 + ReLU. x arrives in its native f32 (tm, 98) layout and is cast to
    # bf16 in-kernel (no host-side pad/cast pass over x); Mosaic pads/masks the
    # K=98 contraction internally. Accumulation is f32.
    x = x_ref[...].astype(jnp.bfloat16)
    h = jnp.dot(x, w1_ref[...], preferred_element_type=jnp.float32) + b1_ref[...]
    h = jnp.maximum(h, 0.0)

    # BatchNorm(eval) folded into fc2 host-side (dropout == identity in eval);
    # fc2 + ReLU. b2's last padded lane is 1.0 and w2's last column is zero, so
    # h[:, ONE_LANE] == relu(0 + 1) == 1 exactly.
    h = jnp.dot(h.astype(jnp.bfloat16), w2_ref[...],
                preferred_element_type=jnp.float32) + b2_ref[...]
    h = jnp.maximum(h, 0.0)

    # BN-folded fc3 as a VPU multiply + lane reduction (avoids a degenerate
    # 1-column MXU matmul). The fc3 bias rides in w3[ONE_LANE] * h[:, ONE_LANE].
    # Output kept as a (tm, 1) column: lane-dense (1, tm) store would need a
    # (tm,1)->(1,tm) relayout with uncertain lowering, for negligible benefit.
    o_ref[...] = jnp.sum(h * w3_ref[...], axis=-1, keepdims=True)


def fold_params(params):
    """Fold eval-mode BatchNorm into fc2/fc3, pad feature dims, cast weights to bf16."""
    (w1t, b1, w2t, b2, w3t, b3, gamma, beta, mean, var) = params
    scale = gamma * lax.rsqrt(var + BN_EPS)        # (1, HID)
    shift = beta - mean * scale                    # (1, HID)

    # h_bn = h*scale + shift  =>  h_bn @ W + b == h @ (scale.T * W) + (shift @ W + b)
    w2t_f = w2t * scale.T                          # (HID, HID)
    b2_f = b2 + shift @ w2t                        # (1, HID)
    w3t_f = w3t * scale.T                          # (HID, 1)
    b3_f = b3 + shift @ w3t                        # (1, 1)

    w1p = jnp.zeros((IN_DIM, HID_PAD), jnp.bfloat16).at[:, :HID].set(
        w1t.astype(jnp.bfloat16))
    b1p = jnp.zeros((1, HID_PAD), jnp.float32).at[:, :HID].set(b1)
    w2p = jnp.zeros((HID_PAD, HID_PAD), jnp.bfloat16).at[:HID, :HID].set(
        w2t_f.astype(jnp.bfloat16))
    b2p = jnp.zeros((1, HID_PAD), jnp.float32).at[:, :HID].set(b2_f)
    b2p = b2p.at[0, ONE_LANE].set(1.0)             # constant-1 lane after ReLU
    w3row = jnp.zeros((1, HID_PAD), jnp.float32).at[:, :HID].set(w3t_f.T)
    w3row = w3row.at[0, ONE_LANE].set(b3_f[0, 0])  # fc3 bias folded into the reduce
    return (w1p, b1p, w2p, b2p, w3row)


def _choose_tm(n_rows):
    # ~1024-row tiles amortize the ~0.35us/grid-step overhead while the
    # per-step VMEM footprint stays far under v5e's 16 MiB scoped default.
    # Keep >=2 grid steps when the batch allows it so the "parallel" axis can
    # shard over v7x's two TensorCores; prefer 128-multiples for alignment.
    if n_rows <= 16:
        return n_rows
    half = _cdiv(n_rows, 2)
    tm = _round_up(half, 128) if half >= 128 else _round_up(half, 8)
    return min(1024, tm, n_rows)


def net_forward(x, folded_params):
    (w1p, b1p, w2p, b2p, w3row) = folded_params
    n = x.shape[0]

    # Only sublane-align the batch (usually a no-op). No lane padding or dtype
    # cast of x on the host -- that would cost a full extra HBM round trip.
    n_rows = _round_up(max(n, 1), 8)
    x_in = x if n_rows == n else jnp.pad(x, ((0, n_rows - n), (0, 0)))

    tm = _choose_tm(n_rows)
    num_tiles = _cdiv(n_rows, tm)   # ragged last tile OK: rows are independent

    const = lambda shape: pl.BlockSpec(shape, lambda i: (0, 0))
    flops = 2 * n_rows * (IN_DIM * HID + HID * HID + HID)
    bytes_accessed = (n_rows * (IN_DIM * 4 + OUT_DIM * 4)
                      + (IN_DIM + HID_PAD) * HID_PAD * 2 + 3 * HID_PAD * 4)

    out = pl.pallas_call(
        mlp_kernel,
        out_shape=jax.ShapeDtypeStruct((num_tiles * tm, OUT_DIM), jnp.float32),
        grid=(num_tiles,),
        in_specs=[
            pl.BlockSpec((tm, IN_DIM), lambda i: (i, 0)),   # x: batch-tiled, native f32
            const((IN_DIM, HID_PAD)),                       # w1 (bf16, VMEM-resident)
            const((1, HID_PAD)),                            # b1
            const((HID_PAD, HID_PAD)),                      # w2 (BN-folded, bf16)
            const((1, HID_PAD)),                            # b2 (BN-folded, +const-1 lane)
            const((1, HID_PAD)),                            # w3 row (BN- & bias-folded)
        ],
        out_specs=pl.BlockSpec((tm, OUT_DIM), lambda i: (i, 0)),
        compiler_params=pltpu.CompilerParams(
            dimension_semantics=("parallel",)),
        cost_estimate=pl.CostEstimate(flops=flops, transcendentals=0,
                                      bytes_accessed=bytes_accessed),
    )(x_in, w1p, b1p, w2p, b2p, w3row)
    return out[:n]


def init_params(key):
    ks = jax.random.split(key, 8)
    # Linear weights stored transposed: (in, out), torch-default-ish scale.
    w1t = jax.random.uniform(ks[0], (IN_DIM, HID), jnp.float32, -0.1, 0.1)
    b1 = jax.random.uniform(ks[1], (1, HID), jnp.float32, -0.1, 0.1)
    w2t = jax.random.uniform(ks[2], (HID, HID), jnp.float32, -0.05, 0.05)
    b2 = jax.random.uniform(ks[3], (1, HID), jnp.float32, -0.05, 0.05)
    w3t = jax.random.uniform(ks[4], (HID, OUT_DIM), jnp.float32, -0.05, 0.05)
    b3 = jax.random.uniform(ks[5], (1, OUT_DIM), jnp.float32, -0.05, 0.05)
    # BatchNorm1d(300): affine params + running stats.
    gamma = 1.0 + 0.1 * jax.random.normal(ks[6], (1, HID), jnp.float32)
    beta = 0.1 * jax.random.normal(ks[7], (1, HID), jnp.float32)
    mean = jnp.zeros((1, HID), jnp.float32)
    var = jnp.ones((1, HID), jnp.float32)
    return (w1t, b1, w2t, b2, w3t, b3, gamma, beta, mean, var)


def reference_forward(x, params):
    """Pure-JAX f32 eval-mode reference with explicit (unfolded) BatchNorm."""
    (w1t, b1, w2t, b2, w3t, b3, gamma, beta, mean, var) = params
    inv = lax.rsqrt(var + BN_EPS)
    h = jnp.maximum(x @ w1t + b1, 0.0)
    h = (h - mean) * inv * gamma + beta
    h = jnp.maximum(h @ w2t + b2, 0.0)
    h = (h - mean) * inv * gamma + beta
    return h @ w3t + b3


if __name__ == "__main__":
    key = jax.random.PRNGKey(0)
    kx, kp, kx2 = jax.random.split(key, 3)
    params = init_params(kp)
    folded = fold_params(params)

    # Small batch: single tile, exercises the tiny-M path.
    batch = 8
    x = jax.random.normal(kx, (batch, IN_DIM), jnp.float32)
    out = jax.block_until_ready(net_forward(x, folded))
    ref = reference_forward(x, params)
    assert out.shape == (batch, OUT_DIM)
    # bf16 weights/activations in the kernel -> loosened tolerance vs f32 ref.
    assert jnp.allclose(out, ref, atol=2e-2, rtol=2e-2), float(
        jnp.max(jnp.abs(out - ref)))

    # Non-multiple batch: exercises the >=2-step parallel grid (v7x megacore)
    # and the ragged last tile (out-of-bounds rows are discarded by slicing).
    batch2 = 300
    x2 = jax.random.normal(kx2, (batch2, IN_DIM), jnp.float32)
    out2 = jax.block_until_ready(net_forward(x2, folded))
    ref2 = reference_forward(x2, params)
    assert out2.shape == (batch2, OUT_DIM)
    assert jnp.allclose(out2, ref2, atol=2e-2, rtol=2e-2), float(
        jnp.max(jnp.abs(out2 - ref2)))

    print("KERNEL_OK")
</pallas_src>

<mosaic_0001>
module attributes {stable_mosaic.version = 11 : i64} {
  func.func @mlp_kernel(%arg0: i32, %arg1: memref<8x98xf32, #tpu.memory_space<vmem>>, %arg2: memref<98x384xbf16, #tpu.memory_space<vmem>>, %arg3: memref<1x384xf32, #tpu.memory_space<vmem>>, %arg4: memref<384x384xbf16, #tpu.memory_space<vmem>>, %arg5: memref<1x384xf32, #tpu.memory_space<vmem>>, %arg6: memref<1x384xf32, #tpu.memory_space<vmem>>, %arg7: memref<8x1xf32, #tpu.memory_space<vmem>>) attributes {dimension_semantics = [#tpu.dimension_semantics<parallel>], iteration_bounds = array<i64: 1>, scalar_prefetch = 0 : i64, scratch_operands = 0 : i64, tpu.core_type = #tpu.core_type<tc>, window_params = [{transform_indices = @transform_0, window_bounds = array<i64: 8, 98>}, {pipeline_mode = #tpu.pipeline_mode<synchronous>, transform_indices = @transform_1, window_bounds = array<i64: 98, 384>}, {pipeline_mode = #tpu.pipeline_mode<synchronous>, transform_indices = @transform_2, window_bounds = array<i64: 1, 384>}, {pipeline_mode = #tpu.pipeline_mode<synchronous>, transform_indices = @transform_3, window_bounds = array<i64: 384, 384>}, {pipeline_mode = #tpu.pipeline_mode<synchronous>, transform_indices = @transform_4, window_bounds = array<i64: 1, 384>}, {pipeline_mode = #tpu.pipeline_mode<synchronous>, transform_indices = @transform_5, window_bounds = array<i64: 1, 384>}, {transform_indices = @transform_6, window_bounds = array<i64: 8, 1>}]} {
    %c0 = arith.constant 0 : index
    %c0_0 = arith.constant 0 : index
    %0 = vector.load %arg1[%c0, %c0_0] : memref<8x98xf32, #tpu.memory_space<vmem>>, vector<8x98xf32>
    %1 = arith.truncf %0 : vector<8x98xf32> to vector<8x98xbf16>
    %c0_1 = arith.constant 0 : index
    %c0_2 = arith.constant 0 : index
    %2 = vector.load %arg2[%c0_1, %c0_2] : memref<98x384xbf16, #tpu.memory_space<vmem>>, vector<98x384xbf16>
    %cst = arith.constant dense<0.000000e+00> : vector<8x384xf32>
    %3 = tpu.matmul %1, %2, %cst {dimension_numbers = #tpu.dot_dimension_numbers<[1], [0], [0], [1], [0, 0, 1, 1], [], []>} : vector<8x98xbf16>, vector<98x384xbf16>, vector<8x384xf32> -> vector<8x384xf32>
    %c0_3 = arith.constant 0 : index
    %c0_4 = arith.constant 0 : index
    %4 = vector.load %arg3[%c0_3, %c0_4] : memref<1x384xf32, #tpu.memory_space<vmem>>, vector<1x384xf32>
    %5 = vector.broadcast %4 : vector<1x384xf32> to vector<8x384xf32>
    %6 = arith.addf %3, %5 : vector<8x384xf32>
    %cst_5 = arith.constant 0.000000e+00 : f32
    %7 = vector.broadcast %cst_5 : f32 to vector<8x384xf32>
    %8 = arith.maximumf %6, %7 : vector<8x384xf32>
    %9 = arith.truncf %8 : vector<8x384xf32> to vector<8x384xbf16>
    %c0_6 = arith.constant 0 : index
    %c0_7 = arith.constant 0 : index
    %10 = vector.load %arg4[%c0_6, %c0_7] : memref<384x384xbf16, #tpu.memory_space<vmem>>, vector<384x384xbf16>
    %cst_8 = arith.constant dense<0.000000e+00> : vector<8x384xf32>
    %11 = tpu.matmul %9, %10, %cst_8 {dimension_numbers = #tpu.dot_dimension_numbers<[1], [0], [0], [1], [0, 0, 1, 1], [], []>} : vector<8x384xbf16>, vector<384x384xbf16>, vector<8x384xf32> -> vector<8x384xf32>
    %c0_9 = arith.constant 0 : index
    %c0_10 = arith.constant 0 : index
    %12 = vector.load %arg5[%c0_9, %c0_10] : memref<1x384xf32, #tpu.memory_space<vmem>>, vector<1x384xf32>
    %13 = vector.broadcast %12 : vector<1x384xf32> to vector<8x384xf32>
    %14 = arith.addf %11, %13 : vector<8x384xf32>
    %cst_11 = arith.constant 0.000000e+00 : f32
    %15 = vector.broadcast %cst_11 : f32 to vector<8x384xf32>
    %16 = arith.maximumf %14, %15 : vector<8x384xf32>
    %c0_12 = arith.constant 0 : index
    %c0_13 = arith.constant 0 : index
    %17 = vector.load %arg6[%c0_12, %c0_13] : memref<1x384xf32, #tpu.memory_space<vmem>>, vector<1x384xf32>
    %18 = vector.broadcast %17 : vector<1x384xf32> to vector<8x384xf32>
    %19 = arith.mulf %16, %18 : vector<8x384xf32>
    %cst_14 = arith.constant dense<0.000000e+00> : vector<8xf32>
    %20 = vector.multi_reduction <add>, %19, %cst_14 [1] : vector<8x384xf32> to vector<8xf32>
    %21 = vector.shape_cast %20 : vector<8xf32> to vector<8x1xf32>
    %c0_15 = arith.constant 0 : index
    %c0_16 = arith.constant 0 : index
    %22 = vector.load %arg7[%c0_15, %c0_16] : memref<8x1xf32, #tpu.memory_space<vmem>>, vector<8x1xf32>
    tpu.vector_store %arg7[%c0_15, %c0_16], %21 {strides = array<i32>} : memref<8x1xf32, #tpu.memory_space<vmem>>, vector<8x1xf32>,
    return
  }
  func.func @transform_0(%arg0: i32) -> (i32, i32) {
    %c0_i32 = arith.constant 0 : i32
    %c0_i32_0 = arith.constant 0 : i32
    return %arg0, %c0_i32 : i32, i32
  }
  func.func @transform_1(%arg0: i32) -> (i32, i32) {
    %c0_i32 = arith.constant 0 : i32
    %c0_i32_0 = arith.constant 0 : i32
    %c0_i32_1 = arith.constant 0 : i32
    return %c0_i32, %c0_i32_0 : i32, i32
  }
  func.func @transform_2(%arg0: i32) -> (i32, i32) {
    %c0_i32 = arith.constant 0 : i32
    %c0_i32_0 = arith.constant 0 : i32
    %c0_i32_1 = arith.constant 0 : i32
    return %c0_i32, %c0_i32_0 : i32, i32
  }
  func.func @transform_3(%arg0: i32) -> (i32, i32) {
    %c0_i32 = arith.constant 0 : i32
    %c0_i32_0 = arith.constant 0 : i32
    %c0_i32_1 = arith.constant 0 : i32
    return %c0_i32, %c0_i32_0 : i32, i32
  }
  func.func @transform_4(%arg0: i32) -> (i32, i32) {
    %c0_i32 = arith.constant 0 : i32
    %c0_i32_0 = arith.constant 0 : i32
    %c0_i32_1 = arith.constant 0 : i32
    return %c0_i32, %c0_i32_0 : i32, i32
  }
  func.func @transform_5(%arg0: i32) -> (i32, i32) {
    %c0_i32 = arith.constant 0 : i32
    %c0_i32_0 = arith.constant 0 : i32
    %c0_i32_1 = arith.constant 0 : i32
    return %c0_i32, %c0_i32_0 : i32, i32
  }
  func.func @transform_6(%arg0: i32) -> (i32, i32) {
    %c0_i32 = arith.constant 0 : i32
    %c0_i32_0 = arith.constant 0 : i32
    return %arg0, %c0_i32 : i32, i32
  }
}

</mosaic_0001>

<bundles_post_ra>
// kernel: tpu_custom_call.1
= control target key start
LH: loop header
LB: loop body
LE: loop exit
PB: predicated region body
PF: predicated region fallthrough
CT: control target
= control target key end

     0   :  { %11 = vsyncpa [#allocation3], 0  ;;  %s1529_s0 = inlined_call_operand.hbm [shape: f32[8,98], index: 0, kind: input, shape index: {}]   ;;  %s1530_s1 = inlined_call_operand.hbm [shape: bf16[98,384], index: 1, kind: input, shape index: {}]   ;;  %s1531_s2 = inlined_call_operand.vmem [shape: f32[1,384], index: 2, kind: input, shape index: {}]   ;;  %s1532_s3 = inlined_call_operand.hbm [shape: bf16[384,384], index: 3, kind: input, shape index: {}]   ;;  %s1533_s4 = inlined_call_operand.vmem [shape: f32[1,384], index: 4, kind: input, shape index: {}]   ;;  %s1534_s5 = inlined_call_operand.vmem [shape: f32[1,384], index: 5, kind: input, shape index: {}]   ;;  %s1535_s6 = inlined_call_operand.vmem [shape: f32[8,1], index: 6, kind: output, shape index: {}]  }
   0x1   :  { %12 = vsyncpa [#allocation5], 0  ;;  %s1387_s21 = smov [#allocation4]   ;;  %s1317_s25 = scalar_lea.hbm %s1530_s1, 2496 }
   0x2   :  { %s28_s22 = sshll.u32 %s1387_s21, 4  ;;  %p1318_p0 = scmp.ne.s32.totalorder %s1530_s1, %s1317_s25  ;;  %s29_s22 = int_to_ptr.vmem [resolvable:$true] %s28_s22 }
   0x3   :  { %p1321_p1 = scmp.lt.u32.totalorder %s1317_s25, %s1530_s1 }
   0x5   :  { %p1323_p2 = pnand %p1321_p1, %p1318_p0 }
   0x7   :  { %1326 = shalt.err (!%p1323_p2)
}
   0x8   :  { %s1327_s30 = scalar_lea.vmem %s29_s22, 2496  ;;  %p1332_p4 = scmp.lt.s32.totalorder %s29_s22, %s29_s22 }
   0x9   :  { %p1328_p3 = scmp.ne.s32.totalorder %s29_s22, %s1327_s30  ;;  %p1333_p5 = scmp.lt.s32.totalorder %s1327_s30, %s1327_s30 }
   0xb   :  { %p1334_p6 = por %p1333_p5, %p1332_p4 }
   0xd   :  { %p1335_p7 = pnand %p1334_p6, %p1328_p3 }
   0xf   :  { %1338 = shalt.err (!%p1335_p7)
}
  0x10   :  { %s1388_s7 = smov 192   ;;  %s1389_s8 = smov 12  }
  0x11   :  { %34 = dma.hbm_to_vmem [thread:$0]  %s1530_s1, 2496, %s29_s22, [#allocation5], %s1388_s7, %s1388_s7, %s1389_s8  }
  0x12   :  { %s1390_s11 = smov [#allocation2]   ;;  %s1391_s13 = smov [#allocation6]  }
  0x13   :  { %s19_s12 = sshll.u32 %s1390_s11, 4  ;;  %s42_s14 = sshll.u32 %s1391_s13, 4  ;;  %s20_s12 = int_to_ptr.vmem [resolvable:$true] %s19_s12  ;;  %s43_s14 = int_to_ptr.vmem [resolvable:$true] %s42_s14 }
  0x14   :  { %s1339_s17 = scalar_lea.hbm %s1529_s0, 128 }
  0x15   :  { %p1340_p8 = scmp.ne.s32.totalorder %s1529_s0, %s1339_s17  ;;  %p1343_p9 = scmp.lt.u32.totalorder %s1339_s17, %s1529_s0 }
  0x17   :  { %p1345_p10 = pnand %p1343_p9, %p1340_p8 }
  0x19   :  { %1348 = shalt.err (!%p1345_p10)
}
  0x1a   :  { %s1349_s1 = scalar_lea.vmem %s20_s12, 128  ;;  %p1354_p12 = scmp.lt.s32.totalorder %s20_s12, %s20_s12 }
  0x1b   :  { %p1350_p11 = scmp.ne.s32.totalorder %s20_s12, %s1349_s1  ;;  %p1355_p13 = scmp.lt.s32.totalorder %s1349_s1, %s1349_s1 }
  0x1d   :  { %p1356_p0 = por %p1355_p13, %p1354_p12 }
  0x1f   :  { %p1357_p1 = pnand %p1356_p0, %p1350_p11 }
  0x21   :  { %1360 = shalt.err (!%p1357_p1)
}
  0x22   :  { %22 = dma.hbm_to_vmem [thread:$0]  %s1529_s0, 128, %s20_s12, [#allocation3]  }
  0x23   :  { %s1361_s26 = scalar_lea.hbm %s1532_s3, 9216 }
  0x24   :  { %p1362_p2 = scmp.ne.s32.totalorder %s1532_s3, %s1361_s26  ;;  %p1365_p3 = scmp.lt.u32.totalorder %s1361_s26, %s1532_s3 }
  0x26   :  { %p1367_p4 = pnand %p1365_p3, %p1362_p2 }
  0x28   :  { %1370 = shalt.err (!%p1367_p4)
}
  0x29   :  { %s1371_s9 = scalar_lea.vmem %s43_s14, 9216  ;;  %p1376_p6 = scmp.lt.s32.totalorder %s43_s14, %s43_s14 }
  0x2a   :  { %p1372_p5 = scmp.ne.s32.totalorder %s43_s14, %s1371_s9  ;;  %p1377_p7 = scmp.lt.s32.totalorder %s1371_s9, %s1371_s9 }
  0x2c   :  { %p1378_p8 = por %p1377_p7, %p1376_p6 }
  0x2e   :  { %p1379_p9 = pnand %p1378_p8, %p1372_p5 }
  0x30   :  { %1382 = shalt.err (!%p1379_p9)
}
  0x31   :  { %48 = dma.hbm_to_vmem [thread:$0]  %s1532_s3, 9216, %s43_s14, [#allocation5], %s1388_s7, %s1388_s7, %s1389_s8  }
  0x32   :  { %1383 = dma.done.wait [#allocation3], 128  }
  0x33   :  { %1384 = vsyncadd [#allocation3], 4294967168 }
  0x34   :  { %1385 = dma.done.wait [#allocation5], 11712  }
  0x35   :  { %1386 = vsyncadd [#allocation5], 4294955584  ;;  %v1392_v0 = vmov 0   ;;  %v1194_v1 = vld [vmem:[#allocation4 + $0x4] ss:$12 sps:$4 sm:$0xff]   ;;  %vm216_vm0 = vcmask 1040384  }
  0x36   :  { %258 = vmatprep.mubr.bf16.mxu1 %v1392_v0  ;;  %v1196_v2 = vld [vmem:[#allocation4] ss:$12 sps:$4 sm:$0xff]   ;;  %226 = vmatprep.subr.bf16.mxu1 %v1194_v1  ;;  %v1197_v3 = vld [vmem:[#allocation4 + $0x1c] ss:$12 sps:$4 sm:$0xff]   ;;  %v1199_v4 = vld [vmem:[#allocation4 + $0x18] ss:$12 sps:$4 sm:$0xff]  }
  0x37   :  { %227 = vmatpush1.bf16.msra.mxu1 %v1196_v2  ;;  %v1200_v5 = vld [vmem:[#allocation4 + $0x34] ss:$12 sps:$4 sm:$0xff]   ;;  %v1202_v6 = vld [vmem:[#allocation4 + $0x30] ss:$12 sps:$4 sm:$0xff]   ;;  %v1203_v7 = vld [vmem:[#allocation4 + $0x4c] ss:$12 sps:$4 sm:$0xff]  }
  0x38   :  { %228 = vmatprep.subr.bf16.mxu1 %v1197_v3  ;;  %v1205_v8 = vld [vmem:[#allocation4 + $0x48] ss:$12 sps:$4 sm:$0xff]   ;;  %v1206_v9 = vld [vmem:[#allocation4 + $0x64] ss:$12 sps:$4 sm:$0xff]   ;;  %v1208_v10 = vld [vmem:[#allocation4 + $0x60] ss:$12 sps:$4 sm:$0xff]  }
  0x39   :  { %v1209_v11 = vld [vmem:[#allocation4 + $0x7c] ss:$12 sps:$4 sm:$0xff]   ;;  %v1221_v12 = vld [vmem:[#allocation6 + $0x4] ss:$12 sps:$4 sm:$0xff]   ;;  %v89_v14 = vld [vmem:[#allocation4 + $0x90] sm:$0x11] }
  0x3a   :  { %v1223_v13 = vld [vmem:[#allocation6] ss:$12 sps:$4 sm:$0xff]   ;;  %v1224_v15 = vld [vmem:[#allocation6 + $0x1c] ss:$12 sps:$4 sm:$0xff]   ;;  %810 = vmatprep.subr.bf16.mxu0 %v1221_v12  ;;  %v1226_v17 = vld [vmem:[#allocation6 + $0x18] ss:$12 sps:$4 sm:$0xff]   ;;  %v1026_v18 = vcombine.high %v89_v14, %v89_v14  ;;  %v1025_v19 = vcombine.low %v89_v14, %v89_v14  ;;  %v93_v14 = vlaneseq }
  0x3b   :  { %229 = vmatpush1.bf16.msra.mxu1 %v1199_v4  ;;  %v1211_v16 = vld [vmem:[#allocation4 + $0x78] ss:$12 sps:$4 sm:$0xff]   ;;  %811 = vmatpush1.bf16.msra.mxu0 %v1223_v13  ;;  %v1227_v20 = vld [vmem:[#allocation6 + $0x34] ss:$12 sps:$4 sm:$0xff]   ;;  %v1230_v24 = vld [vmem:[#allocation6 + $0x4c] ss:$12 sps:$4 sm:$0xff]  }
  0x3c   :  { %230 = vmatprep.subr.bf16.mxu1 %v1200_v5  ;;  %812 = vmatprep.subr.bf16.mxu0 %v1224_v15  ;;  %v63_v21 = vld [vmem:[#allocation2] sm:$0xff]  ;;  %v218_v23 = vsel %vm216_vm0, %v1025_v19, 0  ;;  %vm212_vm1 = vcmask 801792   ;;  %v1214_v26 = vld [vmem:[#allocation4 + $0x8] ss:$12 sps:$4 sm:$0xff]   ;;  %v1393_v27 = vmov 0.0  }
  0x3d   :  { %v1229_v22 = vld [vmem:[#allocation6 + $0x30] ss:$12 sps:$4 sm:$0xff]   ;;  %v1475_v25 = vpack.c.bf16 %v63_v21, %v63_v21  ;;  %v1232_v28 = vld [vmem:[#allocation6 + $0x48] ss:$12 sps:$4 sm:$0xff]   ;;  %vm1394_vm2 = vmmov 0   ;;  %v94_v15 = vshrl.u32 %v93_v14, 7 }
  0x3e   :  { %v1233_v29 = vld [vmem:[#allocation6 + $0x64] ss:$12 sps:$4 sm:$0xff]   ;;  %v1235_v31 = vld [vmem:[#allocation6 + $0x60] ss:$12 sps:$4 sm:$0xff]   ;;  %v1236_v32 = vld [vmem:[#allocation6 + $0x7c] ss:$12 sps:$4 sm:$0xff]  }
  0x3f   :  { %231 = vmatpush1.bf16.msra.mxu1 %v1202_v6  ;;  %813 = vmatpush1.bf16.msra.mxu0 %v1226_v17  ;;  %v1215_v30 = vld [vmem:[#allocation4 + $0x20] ss:$12 sps:$4 sm:$0xff]   ;;  %v1216_v33 = vld [vmem:[#allocation4 + $0x38] ss:$12 sps:$4 sm:$0xff]   ;;  %v1239_v35 = vld [vmem:[#allocation6 + $0x94] ss:$12 sps:$4 sm:$0xff]  }
  0x40   :  { %232 = vmatprep.subr.bf16.mxu1 %v1203_v7  ;;  %814 = vmatprep.subr.bf16.mxu0 %v1227_v20  ;;  %v1238_v34 = vld [vmem:[#allocation6 + $0x78] ss:$12 sps:$4 sm:$0xff]   ;;  %v1217_v36 = vld [vmem:[#allocation4 + $0x50] ss:$12 sps:$4 sm:$0xff]   ;;  %v1241_v37 = vld [vmem:[#allocation6 + $0x90] ss:$12 sps:$4 sm:$0xff]  }
  0x41   :  { %v1242_v38 = vld [vmem:[#allocation6 + $0xac] ss:$12 sps:$4 sm:$0xff]   ;;  %v1244_v40 = vld [vmem:[#allocation6 + $0xa8] ss:$12 sps:$4 sm:$0xff]   ;;  %v1219_v41 = vld [vmem:[#allocation4 + $0x80] ss:$12 sps:$4 sm:$0xff]  }
  0x42   :  { %v1218_v39 = vld [vmem:[#allocation4 + $0x68] ss:$12 sps:$4 sm:$0xff]   ;;  %v1245_v42 = vld [vmem:[#allocation6 + $0xc4] ss:$12 sps:$4 sm:$0xff]   ;;  %v1250_v45 = vld [vmem:[#allocation6 + $0xdc] ss:$12 sps:$4 sm:$0xff]  }
  0x43   :  { %233 = vmatpush1.bf16.msra.mxu1 %v1205_v8  ;;  %815 = vmatpush1.bf16.msra.mxu0 %v1229_v22  ;;  %v1220_v43 = vld [vmem:[#allocation4 + $0x98] ss:$0 sps:$4 sm:$0x11]   ;;  %v1248_v44 = vld [vmem:[#allocation6 + $0xc0] ss:$12 sps:$4 sm:$0xff]   ;;  %vm999_vm3 = vcmask 7168  }
  0x44   :  { %234 = vmatprep.subr.bf16.mxu1 %v1206_v9  ;;  %816 = vmatprep.subr.bf16.mxu0 %v1230_v24  ;;  %v1247_v46 = vld [vmem:[#allocation6 + $0xc8] ss:$12 sps:$4 sm:$0xff]   ;;  %v1253_v47 = vld [vmem:[#allocation6 + $0xd8] ss:$12 sps:$4 sm:$0xff]   ;;  %v224_v49 = vsel %vm216_vm0, %v1220_v43, 0 }
  0x45   :  { %v1255_v48 = vld [vmem:[#allocation6 + $0xf4] ss:$12 sps:$4 sm:$0xff]   ;;  %v1258_v52 = vld [vmem:[#allocation6 + $0xf0] ss:$12 sps:$4 sm:$0xff]   ;;  %v1260_v53 = vld [vmem:[#allocation6 + $0x10c] ss:$12 sps:$4 sm:$0xff]  }
  0x46   :  { %v1249_v50 = vld [vmem:[#allocation6 + $0x8] ss:$12 sps:$4 sm:$0xff]   ;;  %v1252_v51 = vld [vmem:[#allocation6 + $0xe0] ss:$12 sps:$4 sm:$0xff]   ;;  %v1257_v55 = vld [vmem:[#allocation6 + $0xf8] ss:$12 sps:$4 sm:$0xff]  }
  0x47   :  { %235 = vmatpush1.bf16.msra.mxu1 %v1208_v10  ;;  %817 = vmatpush1.bf16.msra.mxu0 %v1232_v28  ;;  %v1254_v54 = vld [vmem:[#allocation6 + $0x20] ss:$12 sps:$4 sm:$0xff]   ;;  %v1263_v56 = vld [vmem:[#allocation6 + $0x108] ss:$12 sps:$4 sm:$0xff]   ;;  %v1265_v57 = vld [vmem:[#allocation6 + $0x124] ss:$12 sps:$4 sm:$0xff]  }
  0x48   :  { %236 = vmatprep.subr.bf16.mxu1 %v1209_v11  ;;  %818 = vmatprep.subr.bf16.mxu0 %v1233_v29  ;;  %v1259_v58 = vld [vmem:[#allocation6 + $0x38] ss:$12 sps:$4 sm:$0xff]   ;;  %v1262_v59 = vld [vmem:[#allocation6 + $0x110] ss:$12 sps:$4 sm:$0xff]   ;;  %v1268_v60 = vld [vmem:[#allocation6 + $0x120] ss:$12 sps:$4 sm:$0xff]  }
  0x49   :  { %v1270_v61 = vld [vmem:[#allocation6 + $0x13c] ss:$12 sps:$4 sm:$0xff]   ;;  %v1273_v1 = vld [vmem:[#allocation6 + $0x138] ss:$12 sps:$4 sm:$0xff]   ;;  %v1272_v3 = vld [vmem:[#allocation6 + $0x140] ss:$12 sps:$4 sm:$0xff]  }
  0x4a   :  { %v1264_v62 = vld [vmem:[#allocation6 + $0x50] ss:$12 sps:$4 sm:$0xff]   ;;  %v1267_v63 = vld [vmem:[#allocation6 + $0x128] ss:$12 sps:$4 sm:$0xff]   ;;  %v1274_v4 = vld [vmem:[#allocation6 + $0x80] ss:$12 sps:$4 sm:$0xff]  }
  0x4b   :  { %237 = vmatpush1.bf16.msra.mxu1 %v1211_v16  ;;  %819 = vmatpush1.bf16.msra.mxu0 %v1235_v31  ;;  %v1269_v2 = vld [vmem:[#allocation6 + $0x68] ss:$12 sps:$4 sm:$0xff]   ;;  %v1277_v6 = vld [vmem:[#allocation6 + $0x158] ss:$12 sps:$4 sm:$0xff]   ;;  %v1278_v7 = vld [vmem:[#allocation6 + $0x150] ss:$12 sps:$4 sm:$0xff]  }
  0x4c   :  { %1028 = vmatprep.subr.msk.bf16.mxu1 %vm216_vm0, %v1026_v18  ;;  %820 = vmatprep.subr.bf16.mxu0 %v1236_v32  ;;  %v1275_v5 = vld [vmem:[#allocation6 + $0x154] ss:$12 sps:$4 sm:$0xff]   ;;  %v1279_v8 = vld [vmem:[#allocation6 + $0x98] ss:$12 sps:$4 sm:$0xff]   ;;  %v1282_v10 = vld [vmem:[#allocation6 + $0x170] ss:$12 sps:$4 sm:$0xff]  }
  0x4d   :  { %v1280_v9 = vld [vmem:[#allocation6 + $0x16c] ss:$12 sps:$4 sm:$0xff]   ;;  %v1283_v11 = vld [vmem:[#allocation6 + $0x168] ss:$12 sps:$4 sm:$0xff]   ;;  %v1284_v12 = vld [vmem:[#allocation6 + $0xb0] ss:$12 sps:$4 sm:$0xff]  }
  0x4e   :  { %v1287_v13 = vld [vmem:[#allocation6 + $0x184] ss:$12 sps:$4 sm:$0xff]   ;;  %v1492_v16 = vsub.s32 0, %v94_v15  ;;  %v91_v17 = vld [vmem:[%s1531_s2] sm:$0x7]  ;;  %v1497_v18 = vsub.s32 1, %v94_v15 }
  0x4f   :  { %239 = vmatpush1.bf16.msra.mxu1 %v218_v23  ;;  %821 = vmatpush1.bf16.msra.mxu0 %v1238_v34  ;;  %v1285_v31 = vld [vmem:[#allocation6 + $0x180] ss:$12 sps:$4 sm:$0xff]   ;;  %v1288_v32 = vld [vmem:[#allocation6 + $0x188] ss:$12 sps:$4 sm:$0xff]   ;;  %v1303_v43 = vld [vmem:[#allocation6 + $0x1e4] ss:$12 sps:$4 sm:$0xff]  }
  0x50   :  { %1142 = vmatprep.subr.bf16.mxu1 %v1393_v27  ;;  %822 = vmatprep.subr.bf16.mxu0 %v1239_v35  ;;  %v96_v19 = vrot.slane %v91_v17, %v1492_v16  ;;  %v100_v20 = vrot.slane %v91_v17, %v1497_v18  ;;  %v1291_v34 = vld [vmem:[#allocation6 + $0x19c] ss:$12 sps:$4 sm:$0xff]   ;;  %v1289_v35 = vld [vmem:[#allocation6 + $0x198] ss:$12 sps:$4 sm:$0xff]  }
  0x52   :  { %1029 = vmatmul.mubr.msk.bf16.vlgmr.msra.gmra.mrb[0].mxu1 %vm212_vm1, %v1475_v25 }
  0x53   :  { %1143 = vmatpush3.bf16.msra.mxu1 %v1214_v26  ;;  %1156 = vmatprep.mubr.msk.bf16.mxu1 %vm1394_vm2, %v1393_v27 }
  0x54   :  { %1144 = vmatprep.subr.bf16.mxu1 %v1393_v27  ;;  %823 = vmatpush1.bf16.msra.mxu0 %v1241_v37  ;;  %v1295_v37 = vld [vmem:[#allocation6 + $0x1b4] ss:$12 sps:$4 sm:$0xff]  }
  0x55   :  { %824 = vmatprep.subr.bf16.mxu0 %v1242_v38  ;;  %v1293_v38 = vld [vmem:[#allocation6 + $0x1b0] ss:$12 sps:$4 sm:$0xff]  }
  0x57   :  { %1145 = vmatpush3.bf16.msra.mxu1 %v1215_v30 }
  0x58   :  { %1146 = vmatprep.subr.bf16.mxu1 %v1393_v27  ;;  %825 = vmatpush1.bf16.msra.mxu0 %v1244_v40  ;;  %v1299_v40 = vld [vmem:[#allocation6 + $0x1cc] ss:$12 sps:$4 sm:$0xff]  }
  0x59   :  { %826 = vmatprep.subr.bf16.mxu0 %v1245_v42  ;;  %v1300_v42 = vld [vmem:[#allocation6 + $0x1d0] ss:$12 sps:$4 sm:$0xff]  }
  0x5b   :  { %1147 = vmatpush3.bf16.msra.mxu1 %v1216_v33 }
  0x5c   :  { %1148 = vmatprep.subr.bf16.mxu1 %v1393_v27  ;;  %827 = vmatpush1.bf16.msra.mxu0 %v1248_v44  ;;  %v1301_v44 = vld [vmem:[#allocation6 + $0x1e0] ss:$12 sps:$4 sm:$0xff]  }
  0x5d   :  { %828 = vmatprep.subr.bf16.mxu0 %v1250_v45  ;;  %v1304_v45 = vld [vmem:[#allocation6 + $0x1e8] ss:$12 sps:$4 sm:$0xff]  }
  0x5f   :  { %1149 = vmatpush3.bf16.msra.mxu1 %v1217_v36  ;;  %v1292_v36 = vld [vmem:[#allocation6 + $0x1a0] ss:$12 sps:$4 sm:$0xff]  }
  0x60   :  { %1150 = vmatprep.subr.bf16.mxu1 %v1393_v27  ;;  %829 = vmatpush1.bf16.msra.mxu0 %v1253_v47 }
  0x61   :  { %830 = vmatprep.subr.bf16.mxu0 %v1255_v48  ;;  %v1305_v48 = vld [vmem:[#allocation6 + $0x1f8] ss:$12 sps:$4 sm:$0xff]  }
  0x63   :  { %1151 = vmatpush3.bf16.msra.mxu1 %v1218_v39  ;;  %v1296_v39 = vld [vmem:[#allocation6 + $0x1b8] ss:$12 sps:$4 sm:$0xff]  }
  0x64   :  { %1152 = vmatprep.subr.bf16.mxu1 %v1393_v27  ;;  %831 = vmatpush1.bf16.msra.mxu0 %v1258_v52 }
  0x65   :  { %832 = vmatprep.subr.bf16.mxu0 %v1260_v53 }
  0x67   :  { %1153 = vmatpush3.bf16.msra.mxu1 %v1219_v41  ;;  %v1297_v41 = vld [vmem:[#allocation6 + $0x1c8] ss:$12 sps:$4 sm:$0xff]  }
  0x68   :  { %1154 = vmatprep.subr.bf16.mxu1 %v1393_v27  ;;  %833 = vmatpush1.bf16.msra.mxu0 %v1263_v56  ;;  %v1312_v56 = vld [vmem:[#allocation6 + $0x218] ss:$12 sps:$4 sm:$0xff]  }
  0x69   :  { %834 = vmatprep.subr.bf16.mxu0 %v1265_v57 }
  0x6b   :  { %1155 = vmatpush3.bf16.msra.mxu1 %v224_v49  ;;  %v1308_v49 = vld [vmem:[#allocation6 + $0x200] ss:$12 sps:$4 sm:$0xff]  }
  0x6c   :  { %1111 = vmatprep.subr.bf16.mxu1 %v1247_v46  ;;  %835 = vmatpush1.bf16.msra.mxu0 %v1268_v60  ;;  %v1307_v46 = vld [vmem:[#allocation6 + $0x1fc] ss:$12 sps:$4 sm:$0xff]  }
  0x6d   :  { %836 = vmatprep.subr.bf16.mxu0 %v1270_v61  ;;  %v1313_v60 = vld [vmem:[#allocation6 + $0x228] ss:$12 sps:$4 sm:$0xff]   ;;  %v1316_v61 = vld [vmem:[#allocation6 + $0x230] ss:$12 sps:$4 sm:$0xff]  }
  0x6e   :  { %1157 = vmatmul.mubr.msk.bf16.vlgmr.msra.gmra.mrb[4].mxu1 %vm212_vm1, %v1475_v25 }
  0x6f   :  { %1112 = vmatpush3.bf16.msra.mxu1 %v1249_v50  ;;  %v1311_v50 = vld [vmem:[#allocation6 + $0x214] ss:$12 sps:$4 sm:$0xff]  }
  0x70   :  { %1113 = vmatprep.subr.bf16.mxu1 %v1252_v51  ;;  %837 = vmatpush1.bf16.msra.mxu0 %v1273_v1 }
  0x71   :  { %838 = vmatprep.subr.bf16.mxu0 %v1275_v5  ;;  %v409_v5 = vld [vmem:[%s1533_s4] sm:$0x7] }
  0x73   :  { %1114 = vmatpush3.bf16.msra.mxu1 %v1254_v54 }
  0x74   :  { %1115 = vmatprep.subr.bf16.mxu1 %v1257_v55  ;;  %839 = vmatpush1.bf16.msra.mxu0 %v1278_v7  ;;  %v1309_v55 = vld [vmem:[#allocation6 + $0x210] ss:$12 sps:$4 sm:$0xff]   ;;  %v414_v7 = vrot.slane %v409_v5, %v1492_v16 }
  0x75   :  { %840 = vmatprep.subr.bf16.mxu0 %v1280_v9 }
  0x77   :  { %1116 = vmatpush3.bf16.msra.mxu1 %v1259_v58  ;;  %v1315_v58 = vld [vmem:[#allocation6 + $0x22c] ss:$12 sps:$4 sm:$0xff]  }
  0x78   :  { %1117 = vmatprep.subr.bf16.mxu1 %v1262_v59  ;;  %841 = vmatpush1.bf16.msra.mxu0 %v1283_v11 }
  0x79   :  { %851 = vmatprep.subr.bf16.mxu0 %v1287_v13 }
  0x7b   :  { %1118 = vmatpush3.bf16.msra.mxu1 %v1264_v62 }
  0x7c   :  { %1119 = vmatprep.subr.bf16.mxu1 %v1267_v63 }
  0x7f   :  { %1120 = vmatpush3.bf16.msra.mxu1 %v1269_v2 }
  0x80   :  { %1121 = vmatprep.subr.bf16.mxu1 %v1272_v3 }
  0x83   :  { %1122 = vmatpush3.bf16.msra.mxu1 %v1274_v4 }
  0x84   :  { %1123 = vmatprep.subr.bf16.mxu1 %v1277_v6 }
  0x87   :  { %1124 = vmatpush3.bf16.msra.mxu1 %v1279_v8  ;;  %v418_v8 = vrot.slane %v409_v5, %v1497_v18 }
  0x88   :  { %1125 = vmatprep.subr.bf16.mxu1 %v1282_v10 }
  0x8b   :  { %1126 = vmatpush3.bf16.msra.mxu1 %v1284_v12 }
  0x8c   :  { %1160 = vmatprep.subr.bf16.mxu1 %v1393_v27 }
 0x125   :  { %v260_v21 = vpop.f32.mrb[0].mxu1 }
 0x126   :  { %v261_v22 = vadd.f32 %v260_v21, %v96_v19  ;;  %v262_v23 = vpop.f32.mrb[1].mxu1 }
 0x127   :  { %v263_v24 = vadd.f32 %v262_v23, %v100_v20  ;;  %v264_v25 = vpop.f32.mrb[2].mxu1 }
 0x128   :  { %v307_v26 = vmax.f32 %v261_v22, 0.0  ;;  %v265_v28 = vpop.f32.mrb[3].mxu1 }
 0x129   :  { %v308_v29 = vmax.f32 %v263_v24, 0.0 }
 0x12a   :  { %v310_v33 = vpack.c.bf16 %v307_v26, %v307_v26 }
 0x12b   :  { %v311_v30 = vpack.c.bf16 %v308_v29, %v308_v29 }
 0x12d   :  { %842 = vmatprep.mubr.bf16.mxu0 %v311_v30  ;;  %924 = vmatprep.mubr.bf16.mxu1 %v311_v30 }
 0x12e   :  { %843 = vmatmul.mubr.bf16.vlgmr.msra.gmra.mrb[0].mxu0 %v310_v33  ;;  %925 = vmatmul.mubr.bf16.vlgmr.msra.gmra.mrb[8].mxu1 %v310_v33 }
 0x12f   :  { %852 = vmatpush1.bf16.msra.mxu0 %v1285_v31  ;;  %1161 = vmatpush3.bf16.msra.mxu1 %v1288_v32 }
 0x130   :  { %853 = vmatprep.subr.bf16.mxu0 %v1291_v34  ;;  %1162 = vmatprep.subr.bf16.mxu1 %v1393_v27 }
 0x131   :  { %883 = vmatprep.mubr.bf16.mxu0 %v1392_v0  ;;  %1176 = vmatprep.mubr.msk.bf16.mxu1 %vm1394_vm2, %v1393_v27  ;;  %v1507_v0 = vsub.s32 2, %v94_v15 }
 0x133   :  { %854 = vmatpush1.bf16.msra.mxu0 %v1289_v35  ;;  %1163 = vmatpush3.bf16.msra.mxu1 %v1292_v36  ;;  %v104_v47 = vrot.slane %v91_v17, %v1507_v0  ;;  %v422_v6 = vrot.slane %v409_v5, %v1507_v0 }
 0x134   :  { %855 = vmatprep.subr.bf16.mxu0 %v1295_v37  ;;  %1164 = vmatprep.subr.bf16.mxu1 %v1393_v27 }
 0x137   :  { %856 = vmatpush1.bf16.msra.mxu0 %v1293_v38  ;;  %1165 = vmatpush3.bf16.msra.mxu1 %v1296_v39 }
 0x138   :  { %857 = vmatprep.subr.bf16.mxu0 %v1299_v40  ;;  %1166 = vmatprep.subr.bf16.mxu1 %v1393_v27 }
 0x13b   :  { %858 = vmatpush1.bf16.msra.mxu0 %v1297_v41  ;;  %1167 = vmatpush3.bf16.msra.mxu1 %v1300_v42 }
 0x13c   :  { %859 = vmatprep.subr.bf16.mxu0 %v1303_v43  ;;  %1168 = vmatprep.subr.bf16.mxu1 %v1393_v27 }
 0x13f   :  { %860 = vmatpush1.bf16.msra.mxu0 %v1301_v44  ;;  %1169 = vmatpush3.bf16.msra.mxu1 %v1304_v45 }
 0x140   :  { %861 = vmatprep.subr.bf16.mxu0 %v1307_v46  ;;  %1170 = vmatprep.subr.bf16.mxu1 %v1393_v27 }
 0x141   :  { %v301_v51 = vpop.f32.mrb[4].mxu1 }
 0x142   :  { %v302_v52 = vadd.f32 %v301_v51, %v104_v47  ;;  %v1158_v53 = vpop.f32.mrb[5].mxu1 }
 0x143   :  { %862 = vmatpush1.bf16.msra.mxu0 %v1305_v48  ;;  %1171 = vmatpush3.bf16.msra.mxu1 %v1308_v49  ;;  %v304_v54 = vpop.f32.mrb[6].mxu1 }
 0x144   :  { %863 = vmatprep.subr.bf16.mxu0 %v1311_v50  ;;  %1172 = vmatprep.subr.bf16.mxu1 %v1393_v27  ;;  %v1159_v57 = vpop.f32.mrb[7].mxu1  ;;  %v309_v59 = vmax.f32 %v302_v52, 0.0 }
 0x146   :  { %v312_v62 = vpack.c.bf16 %v309_v59, %v309_v59 }
 0x147   :  { %864 = vmatpush1.bf16.msra.mxu0 %v1309_v55  ;;  %1173 = vmatpush3.bf16.msra.mxu1 %v1312_v56 }
 0x148   :  { %865 = vmatprep.subr.bf16.mxu0 %v1315_v58  ;;  %1174 = vmatprep.subr.bf16.mxu1 %v1393_v27  ;;  %v975_v27 = vld [vmem:[%s1534_s5] sm:$0x7] }
 0x149   :  { %v980_v13 = vrot.slane %v975_v27, %v1492_v16  ;;  %v984_v20 = vrot.slane %v975_v27, %v1497_v18  ;;  %v988_v29 = vrot.slane %v975_v27, %v1507_v0 }
 0x14b   :  { %866 = vmatpush1.bf16.msra.mxu0 %v1313_v60  ;;  %1175 = vmatpush3.bf16.msra.mxu1 %v1316_v61 }
 0x14e   :  { %884 = vmatmul.mubr.bf16.vlgmr.msra.gmra.mrb[0].mxu0 %v312_v62  ;;  %1177 = vmatmul.mubr.bf16.vlgmr.msra.gmra.mrb[12].mxu1 %v312_v62 }
 0x201   :  { %v1127_v63 = vpop.f32.mrb[8].mxu1 }
 0x202   :  { %v1128_v1 = vpop.f32.mrb[9].mxu1 }
 0x203   :  { %v1129_v2 = vadd.f32 %v1128_v1, %v1127_v63  ;;  %v1130_v3 = vpop.f32.mrb[10].mxu1 }
 0x204   :  { %v1131_v4 = vpop.f32.mrb[11].mxu1 }
 0x205   :  { %v927_v9 = vadd.f32 %v1129_v2, %v422_v6 }
 0x221   :  { %v885_v10 = vpop.f32.mrb[0].mxu0  ;;  %v966_v11 = vpop.f32.mrb[12].mxu1 }
 0x222   :  { %v1180_v12 = vadd.f32 %v885_v10, %v414_v7  ;;  %v967_v14 = vadd.f32 %v966_v11, %v927_v9  ;;  %v887_v15 = vpop.f32.mrb[1].mxu0  ;;  %v1178_v17 = vpop.f32.mrb[13].mxu1 }
 0x223   :  { %v1181_v19 = vadd.f32 %v887_v15, %v418_v8  ;;  %v889_v21 = vpop.f32.mrb[2].mxu0  ;;  %v969_v22 = vpop.f32.mrb[14].mxu1 }
 0x224   :  { %v972_v23 = vmax.f32 %v1180_v12, 0.0  ;;  %v890_v24 = vpop.f32.mrb[3].mxu0  ;;  %v1179_v25 = vpop.f32.mrb[15].mxu1  ;;  %v974_v26 = vmax.f32 %v967_v14, 0.0 }
 0x225   :  { %v973_v28 = vmax.f32 %v1181_v19, 0.0 }
 0x226   :  { %v992_v30 = vmul.f32 %v980_v13, %v972_v23  ;;  %v994_v32 = vmul.f32 %v988_v29, %v974_v26 }
 0x227   :  { %v993_v31 = vmul.f32 %v984_v20, %v973_v28 }
 0x229   :  { %v995_v33 = vadd.f32 %v993_v31, %v992_v30 }
 0x22b   :  { %v996_v16 = vadd.f32 %v995_v33, %v994_v32 }
 0x22d   :  { %997 = vadd.xlane.f32.xlu0 %v996_v16 }
 0x2ba   :  { %v998_v34 = vpop.xlane.xlu0 %997 }
 0x2bb   :  { %1000 = vst.msk [vmem:[%s1535_s6] sm:$0xff] %vm999_vm3, %v998_v34 }
 0x2bc   :  { %1005 = vsyncpa [#allocation3], 1 }
 0x2bd   :  { %1006 = vsyncpa [#allocation5], 1 }

</bundles_post_ra>
